<compile_context>
chip_gen: v6e
topology: v6e:2x2x1
jax: 0.10.0
libtpu: 0.0.40
codegen_flags: <defaults>
</compile_context>

<pallas_src>
import functools

import jax
import jax.numpy as jnp
import numpy as np
from jax.experimental import pallas as pl
from jax.experimental.pallas import tpu as pltpu


def rcam_kernel(x_ref, w1_ref, b1_ref, w2_ref, b2_ref,
                w3_ref, b3_ref, w4_ref, b4_ref, o_ref, *, hw, bb):
    # x_ref: (C_in, bb*hw) -- channels on sublanes, batch*spatial on lanes.
    x = x_ref[...]

    # --- pre_attention: Conv1x1 -> ReLU -> Conv1x1 (folded across bb images) ---
    h = jnp.dot(w1_ref[...], x, preferred_element_type=jnp.float32) + b1_ref[...]
    h = jnp.maximum(h, 0.0)
    x_pre = (jnp.dot(w2_ref[...], h, preferred_element_type=jnp.float32)
             + b2_ref[...])                                    # (F, bb*hw)

    inv_hw = 1.0 / hw
    # Per-image attention (bb is tiny; static unroll, lane-aligned slices).
    for b in range(bb):
        seg = x_pre[:, b * hw:(b + 1) * hw]                    # (F, hw)

        # --- attention_computation: GAP -> Conv1x1 -> ReLU -> Conv1x1 -> Sigmoid ---
        pooled = jnp.sum(seg, axis=1, keepdims=True) * inv_hw  # (F, 1)
        a = jnp.maximum(
            jnp.dot(w3_ref[...], pooled,
                    preferred_element_type=jnp.float32) + b3_ref[...], 0.0)  # (F/r, 1)
        att = jax.nn.sigmoid(
            jnp.dot(w4_ref[...], a,
                    preferred_element_type=jnp.float32) + b4_ref[...])       # (F, 1)

        # --- post_attention = X_pre * att + X_pre = X_pre * (1 + att) ---
        o_ref[:, b * hw:(b + 1) * hw] = (seg * (1.0 + att)).astype(o_ref.dtype)


def rcam_forward(x_nchw, params, *, batch_block=None):
    """x_nchw: (B, C_in, H, W) float32 (PyTorch NCHW). Returns (B, F, H, W)."""
    B, Cin, H, W = x_nchw.shape
    HW = H * W
    F = params["w2"].shape[0]

    if batch_block is None:
        # Fold images per grid step, but keep >= 2 grid steps when possible
        # (v7x has 2 TensorCores; on v5e/v6e this is a no-op).
        batch_block = max(1, B // 2)
        while B % batch_block:
            batch_block -= 1
    assert B % batch_block == 0
    grid = B // batch_block
    lanes = batch_block * HW
    assert lanes % 128 == 0, "batch_block * H * W must be a multiple of 128"

    # Pack NCHW -> (C_in, B*HW): pure regrouping of the channel-major layout.
    x_pk = jnp.transpose(x_nchw.reshape(B, Cin, HW), (1, 0, 2)).reshape(Cin, B * HW)

    def full_spec(arr):
        nd = arr.ndim
        return pl.BlockSpec(arr.shape, lambda g, _n=nd: (0,) * _n)

    # Explicit VMEM budget sized to the actual (sublane-padded) blocks + headroom.
    itemsize = 4
    block_bytes = itemsize * lanes * (max(Cin, 8) + max(F, 8))
    vmem_limit = int(min(64 << 20, max(16 << 20, 8 * block_bytes)))

    kern = functools.partial(rcam_kernel, hw=HW, bb=batch_block)

    out_pk = pl.pallas_call(
        kern,
        out_shape=jax.ShapeDtypeStruct((F, B * HW), jnp.float32),
        grid_spec=pltpu.PrefetchScalarGridSpec(
            num_scalar_prefetch=0,
            grid=(grid,),
            in_specs=[
                pl.BlockSpec((Cin, lanes), lambda g: (0, g)),   # lane-dense input block
                full_spec(params["w1"]), full_spec(params["b1"]),
                full_spec(params["w2"]), full_spec(params["b2"]),
                full_spec(params["w3"]), full_spec(params["b3"]),
                full_spec(params["w4"]), full_spec(params["b4"]),
            ],
            out_specs=pl.BlockSpec((F, lanes), lambda g: (0, g)),  # lane-dense output
        ),
        compiler_params=pltpu.CompilerParams(
            dimension_semantics=("parallel",),
            vmem_limit_bytes=vmem_limit,
        ),
    )(x_pk, params["w1"], params["b1"], params["w2"], params["b2"],
      params["w3"], params["b3"], params["w4"], params["b4"])

    # Unpack (F, B*HW) -> (B, F, H, W) to match the PyTorch module's output.
    return jnp.transpose(out_pk.reshape(F, B, HW), (1, 0, 2)).reshape(B, F, H, W)


def make_params(key, in_channels, n_features=64, reduction=4):
    """Deterministic synthetic parameters (PyTorch Conv2d 1x1 equivalents).

    Conv2d weight (out, in, 1, 1) is stored as (out, in); bias as a column
    (out, 1) so it broadcasts over the lane (spatial) axis inside the kernel.
    """
    fr = n_features // reduction
    ks = jax.random.split(key, 8)

    def u(k, shape, fan_in):
        bound = 1.0 / np.sqrt(fan_in)
        return jax.random.uniform(k, shape, jnp.float32, -bound, bound)

    return {
        "w1": u(ks[0], (n_features, in_channels), in_channels),
        "b1": u(ks[1], (n_features, 1), in_channels),
        "w2": u(ks[2], (n_features, n_features), n_features),
        "b2": u(ks[3], (n_features, 1), n_features),
        "w3": u(ks[4], (fr, n_features), n_features),
        "b3": u(ks[5], (fr, 1), n_features),
        "w4": u(ks[6], (n_features, fr), fr),
        "b4": u(ks[7], (n_features, 1), fr),
    }


def rcam_reference(x_nchw, p):
    """Plain-JAX reference of the PyTorch forward (NCHW in / NCHW out)."""
    B, Cin, H, W = x_nchw.shape
    x = x_nchw.reshape(B, Cin, H * W)
    h = jnp.maximum(jnp.einsum("fc,bcn->bfn", p["w1"], x) + p["b1"][None], 0.0)
    x_pre = jnp.einsum("fg,bgn->bfn", p["w2"], h) + p["b2"][None]
    pooled = jnp.mean(x_pre, axis=2, keepdims=True)
    a = jnp.maximum(jnp.einsum("rf,bfn->brn", p["w3"], pooled) + p["b3"][None], 0.0)
    att = jax.nn.sigmoid(jnp.einsum("fr,brn->bfn", p["w4"], a) + p["b4"][None])
    out = x_pre * att + x_pre
    return out.reshape(B, -1, H, W)


if __name__ == "__main__":
    # Shapes consistent with RCAM(in_channels=4, n_features=64, reduction=4)
    B, C_in, H, W = 2, 4, 16, 16
    n_features, reduction = 64, 4

    key = jax.random.PRNGKey(0)
    k_x, k_p = jax.random.split(key)

    x = jax.random.normal(k_x, (B, C_in, H, W), jnp.float32)   # NCHW, like PyTorch
    params = make_params(k_p, C_in, n_features, reduction)

    ref = rcam_reference(x, params)

    # Default: one image per grid step -> grid=(2,), both steps "parallel".
    out = jax.block_until_ready(rcam_forward(x, params))
    np.testing.assert_allclose(np.asarray(out), np.asarray(ref),
                               rtol=1e-5, atol=1e-5)

    # Batch-folded path: all images fused into a single grid step.
    out_folded = jax.block_until_ready(rcam_forward(x, params, batch_block=B))
    np.testing.assert_allclose(np.asarray(out_folded), np.asarray(ref),
                               rtol=1e-5, atol=1e-5)

    print("KERNEL_OK")
</pallas_src>

<mosaic_0001>
module attributes {stable_mosaic.version = 11 : i64} {
  func.func @rcam_kernel(%arg0: i32, %arg1: memref<4x256xf32, #tpu.memory_space<vmem>>, %arg2: memref<64x4xf32, #tpu.memory_space<vmem>>, %arg3: memref<64x1xf32, #tpu.memory_space<vmem>>, %arg4: memref<64x64xf32, #tpu.memory_space<vmem>>, %arg5: memref<64x1xf32, #tpu.memory_space<vmem>>, %arg6: memref<16x64xf32, #tpu.memory_space<vmem>>, %arg7: memref<16x1xf32, #tpu.memory_space<vmem>>, %arg8: memref<64x16xf32, #tpu.memory_space<vmem>>, %arg9: memref<64x1xf32, #tpu.memory_space<vmem>>, %arg10: memref<64x256xf32, #tpu.memory_space<vmem>>) attributes {dimension_semantics = [#tpu.dimension_semantics<parallel>], iteration_bounds = array<i64: 2>, scalar_prefetch = 0 : i64, scratch_operands = 0 : i64, tpu.core_type = #tpu.core_type<tc>, window_params = [{transform_indices = @transform_0, window_bounds = array<i64: 4, 256>}, {pipeline_mode = #tpu.pipeline_mode<synchronous>, transform_indices = @transform_1, window_bounds = array<i64: 64, 4>}, {pipeline_mode = #tpu.pipeline_mode<synchronous>, transform_indices = @transform_2, window_bounds = array<i64: 64, 1>}, {pipeline_mode = #tpu.pipeline_mode<synchronous>, transform_indices = @transform_3, window_bounds = array<i64: 64, 64>}, {pipeline_mode = #tpu.pipeline_mode<synchronous>, transform_indices = @transform_4, window_bounds = array<i64: 64, 1>}, {pipeline_mode = #tpu.pipeline_mode<synchronous>, transform_indices = @transform_5, window_bounds = array<i64: 16, 64>}, {pipeline_mode = #tpu.pipeline_mode<synchronous>, transform_indices = @transform_6, window_bounds = array<i64: 16, 1>}, {pipeline_mode = #tpu.pipeline_mode<synchronous>, transform_indices = @transform_7, window_bounds = array<i64: 64, 16>}, {pipeline_mode = #tpu.pipeline_mode<synchronous>, transform_indices = @transform_8, window_bounds = array<i64: 64, 1>}, {transform_indices = @transform_9, window_bounds = array<i64: 64, 256>}]} {
    %c0 = arith.constant 0 : index
    %c0_0 = arith.constant 0 : index
    %0 = vector.load %arg1[%c0, %c0_0] : memref<4x256xf32, #tpu.memory_space<vmem>>, vector<4x256xf32>
    %c0_1 = arith.constant 0 : index
    %c0_2 = arith.constant 0 : index
    %1 = vector.load %arg2[%c0_1, %c0_2] : memref<64x4xf32, #tpu.memory_space<vmem>>, vector<64x4xf32>
    %cst = arith.constant dense<0.000000e+00> : vector<64x256xf32>
    %2 = tpu.matmul %1, %0, %cst {dimension_numbers = #tpu.dot_dimension_numbers<[1], [0], [0], [1], [0, 0, 1, 1], [], []>} : vector<64x4xf32>, vector<4x256xf32>, vector<64x256xf32> -> vector<64x256xf32>
    %c0_3 = arith.constant 0 : index
    %c0_4 = arith.constant 0 : index
    %3 = vector.load %arg3[%c0_3, %c0_4] : memref<64x1xf32, #tpu.memory_space<vmem>>, vector<64x1xf32>
    %4 = vector.broadcast %3 : vector<64x1xf32> to vector<64x256xf32>
    %5 = arith.addf %2, %4 : vector<64x256xf32>
    %cst_5 = arith.constant 0.000000e+00 : f32
    %6 = vector.broadcast %cst_5 : f32 to vector<64x256xf32>
    %7 = arith.maximumf %5, %6 : vector<64x256xf32>
    %c0_6 = arith.constant 0 : index
    %c0_7 = arith.constant 0 : index
    %8 = vector.load %arg4[%c0_6, %c0_7] : memref<64x64xf32, #tpu.memory_space<vmem>>, vector<64x64xf32>
    %cst_8 = arith.constant dense<0.000000e+00> : vector<64x256xf32>
    %9 = tpu.matmul %8, %7, %cst_8 {dimension_numbers = #tpu.dot_dimension_numbers<[1], [0], [0], [1], [0, 0, 1, 1], [], []>} : vector<64x64xf32>, vector<64x256xf32>, vector<64x256xf32> -> vector<64x256xf32>
    %c0_9 = arith.constant 0 : index
    %c0_10 = arith.constant 0 : index
    %10 = vector.load %arg5[%c0_9, %c0_10] : memref<64x1xf32, #tpu.memory_space<vmem>>, vector<64x1xf32>
    %11 = vector.broadcast %10 : vector<64x1xf32> to vector<64x256xf32>
    %12 = arith.addf %9, %11 : vector<64x256xf32>
    %cst_11 = arith.constant dense<0.000000e+00> : vector<64xf32>
    %13 = vector.multi_reduction <add>, %12, %cst_11 [1] : vector<64x256xf32> to vector<64xf32>
    %14 = vector.shape_cast %13 : vector<64xf32> to vector<64x1xf32>
    %cst_12 = arith.constant 3.906250e-03 : f32
    %15 = vector.broadcast %cst_12 : f32 to vector<64x1xf32>
    %16 = arith.mulf %14, %15 : vector<64x1xf32>
    %c0_13 = arith.constant 0 : index
    %c0_14 = arith.constant 0 : index
    %17 = vector.load %arg6[%c0_13, %c0_14] : memref<16x64xf32, #tpu.memory_space<vmem>>, vector<16x64xf32>
    %cst_15 = arith.constant dense<0.000000e+00> : vector<16x1xf32>
    %18 = tpu.matmul %17, %16, %cst_15 {dimension_numbers = #tpu.dot_dimension_numbers<[1], [0], [0], [1], [0, 0, 1, 1], [], []>} : vector<16x64xf32>, vector<64x1xf32>, vector<16x1xf32> -> vector<16x1xf32>
    %c0_16 = arith.constant 0 : index
    %c0_17 = arith.constant 0 : index
    %19 = vector.load %arg7[%c0_16, %c0_17] : memref<16x1xf32, #tpu.memory_space<vmem>>, vector<16x1xf32>
    %20 = arith.addf %18, %19 : vector<16x1xf32>
    %cst_18 = arith.constant 0.000000e+00 : f32
    %21 = vector.broadcast %cst_18 : f32 to vector<16x1xf32>
    %22 = arith.maximumf %20, %21 : vector<16x1xf32>
    %c0_19 = arith.constant 0 : index
    %c0_20 = arith.constant 0 : index
    %23 = vector.load %arg8[%c0_19, %c0_20] : memref<64x16xf32, #tpu.memory_space<vmem>>, vector<64x16xf32>
    %cst_21 = arith.constant dense<0.000000e+00> : vector<64x1xf32>
    %24 = tpu.matmul %23, %22, %cst_21 {dimension_numbers = #tpu.dot_dimension_numbers<[1], [0], [0], [1], [0, 0, 1, 1], [], []>} : vector<64x16xf32>, vector<16x1xf32>, vector<64x1xf32> -> vector<64x1xf32>
    %c0_22 = arith.constant 0 : index
    %c0_23 = arith.constant 0 : index
    %25 = vector.load %arg9[%c0_22, %c0_23] : memref<64x1xf32, #tpu.memory_space<vmem>>, vector<64x1xf32>
    %26 = arith.addf %24, %25 : vector<64x1xf32>
    %27 = arith.negf %26 : vector<64x1xf32>
    %28 = math.exp %27 : vector<64x1xf32>
    %cst_24 = arith.constant 1.000000e+00 : f32
    %29 = vector.broadcast %cst_24 : f32 to vector<64x1xf32>
    %30 = arith.addf %29, %28 : vector<64x1xf32>
    %31 = arith.divf %29, %30 : vector<64x1xf32>
    %cst_25 = arith.constant 1.000000e+00 : f32
    %32 = vector.broadcast %cst_25 : f32 to vector<64x1xf32>
    %33 = arith.addf %32, %31 : vector<64x1xf32>
    %34 = vector.broadcast %33 : vector<64x1xf32> to vector<64x256xf32>
    %35 = arith.mulf %12, %34 : vector<64x256xf32>
    %c0_26 = arith.constant 0 : index
    %c0_27 = arith.constant 0 : index
    %36 = vector.load %arg10[%c0_26, %c0_27] : memref<64x256xf32, #tpu.memory_space<vmem>>, vector<64x256xf32>
    tpu.vector_store %arg10[%c0_26, %c0_27], %35 {strides = array<i32>} : memref<64x256xf32, #tpu.memory_space<vmem>>, vector<64x256xf32>,
    return
  }
  func.func @transform_0(%arg0: i32) -> (i32, i32) {
    %c0_i32 = arith.constant 0 : i32
    %c0_i32_0 = arith.constant 0 : i32
    return %c0_i32, %arg0 : i32, i32
  }
  func.func @transform_1(%arg0: i32) -> (i32, i32) {
    %c0_i32 = arith.constant 0 : i32
    %c0_i32_0 = arith.constant 0 : i32
    %c0_i32_1 = arith.constant 0 : i32
    return %c0_i32, %c0_i32_0 : i32, i32
  }
  func.func @transform_2(%arg0: i32) -> (i32, i32) {
    %c0_i32 = arith.constant 0 : i32
    %c0_i32_0 = arith.constant 0 : i32
    %c0_i32_1 = arith.constant 0 : i32
    return %c0_i32, %c0_i32_0 : i32, i32
  }
  func.func @transform_3(%arg0: i32) -> (i32, i32) {
    %c0_i32 = arith.constant 0 : i32
    %c0_i32_0 = arith.constant 0 : i32
    %c0_i32_1 = arith.constant 0 : i32
    return %c0_i32, %c0_i32_0 : i32, i32
  }
  func.func @transform_4(%arg0: i32) -> (i32, i32) {
    %c0_i32 = arith.constant 0 : i32
    %c0_i32_0 = arith.constant 0 : i32
    %c0_i32_1 = arith.constant 0 : i32
    return %c0_i32, %c0_i32_0 : i32, i32
  }
  func.func @transform_5(%arg0: i32) -> (i32, i32) {
    %c0_i32 = arith.constant 0 : i32
    %c0_i32_0 = arith.constant 0 : i32
    %c0_i32_1 = arith.constant 0 : i32
    return %c0_i32, %c0_i32_0 : i32, i32
  }
  func.func @transform_6(%arg0: i32) -> (i32, i32) {
    %c0_i32 = arith.constant 0 : i32
    %c0_i32_0 = arith.constant 0 : i32
    %c0_i32_1 = arith.constant 0 : i32
    return %c0_i32, %c0_i32_0 : i32, i32
  }
  func.func @transform_7(%arg0: i32) -> (i32, i32) {
    %c0_i32 = arith.constant 0 : i32
    %c0_i32_0 = arith.constant 0 : i32
    %c0_i32_1 = arith.constant 0 : i32
    return %c0_i32, %c0_i32_0 : i32, i32
  }
  func.func @transform_8(%arg0: i32) -> (i32, i32) {
    %c0_i32 = arith.constant 0 : i32
    %c0_i32_0 = arith.constant 0 : i32
    %c0_i32_1 = arith.constant 0 : i32
    return %c0_i32, %c0_i32_0 : i32, i32
  }
  func.func @transform_9(%arg0: i32) -> (i32, i32) {
    %c0_i32 = arith.constant 0 : i32
    %c0_i32_0 = arith.constant 0 : i32
    return %c0_i32, %arg0 : i32, i32
  }
}

</mosaic_0001>

<bundles_post_ra>
// kernel: tpu_custom_call.1
= control target key start
LH: loop header
LB: loop body
LE: loop exit
PB: predicated region body
PF: predicated region fallthrough
CT: control target
= control target key end

     0   :  { %14 = vsyncpa [#allocation3], 0  ;;  %s1904_s0 = inlined_call_operand.vmem [shape: f32[4,512], index: 0, kind: input, shape index: {}]   ;;  %s1905_s1 = inlined_call_operand.vmem [shape: f32[64,4], index: 1, kind: input, shape index: {}]   ;;  %s1906_s2 = inlined_call_operand.vmem [shape: f32[64,1], index: 2, kind: input, shape index: {}]   ;;  %s1907_s3 = inlined_call_operand.vmem [shape: f32[64,64], index: 3, kind: input, shape index: {}]   ;;  %s1908_s4 = inlined_call_operand.vmem [shape: f32[64,1], index: 4, kind: input, shape index: {}]   ;;  %s1909_s5 = inlined_call_operand.vmem [shape: f32[16,64], index: 5, kind: input, shape index: {}]   ;;  %s1910_s6 = inlined_call_operand.vmem [shape: f32[16,1], index: 6, kind: input, shape index: {}]   ;;  %s1911_s7 = inlined_call_operand.vmem [shape: f32[64,16], index: 7, kind: input, shape index: {}]   ;;  %s1912_s8 = inlined_call_operand.vmem [shape: f32[64,1], index: 8, kind: input, shape index: {}]   ;;  %s1913_s9 = inlined_call_operand.hbm [shape: f32[64,512], index: 9, kind: output, shape index: {}]  }
   0x1   :  { %16 = vsyncpa [#allocation3 + $0x1], 0  ;;  %s1518_s30 = smov 0   ;;  %s1520_s10 = smov 0  }
   0x2   :  { %s1522_s11 = smov 0   ;;  %s1524_s12 = smov 0  }
   0x3 LB: > { %s1539_s13 = sadd.s32 4294967295, %s1460_s12   ;;  %s1215_s14 = sadd.s32 4294967294, %s1460_s12   ;;  %s1460_s12 = sphi %s1524_s12, %s1919_s12   ;;  %s1456_s11 = sphi %s1522_s11, %s1918_s11   ;;  %s1452_s10 = sphi %s1520_s10, %s1917_s10   ;;  %s1448_s30 = sphi %s1518_s30, %s1916_s30  }
   0x4   : > { %s1543_s15 = sadd.s32 1, %s1460_s12   ;;  %s223_s16 = sadd.s32 1, %s1456_s11 }
   0x5   : > { %s220_s17 = ssub.s32 %s1460_s12, %s1543_s15  ;;  %p233_p0 = scmp.ne.s32.totalorder %s1456_s11, %s1452_s10 }
   0x6   : > { %p221_p1 = scmp.eq.s32.totalorder %s220_s17, 0  ;;  %p234_p2 = scmp.eq.s32.totalorder %s1539_s13, 1 }
   0x7   : > { %p239_p3 = scmp.ne.s32.totalorder %s1452_s10, %s1448_s30  ;;  %p240_p4 = scmp.eq.s32.totalorder %s1215_s14, 1 }
   0x8   : > { %s1554_s18 = scalar_select %p221_p1, %s1456_s11, %s223_s16  }
   0x9   : > { %p1556_p5 = por %p234_p2, %p233_p0  ;;  %p1560_p6 = por %p240_p4, %p239_p3 }
   0xa   : > { %p1218_p7 = scmp.ge.s32.totalorder %s1460_s12, 1  ;;  %p291_p8 = scmp.lt.s32.totalorder %s1460_s12, 3 }
   0xc   : > { %p292_p9 = pnand %p1218_p7, %p291_p8 }
   0xd   : > { %s1220_s21 = sshll.u32 (!%p292_p9), %s1539_s13, 1  ;;  %s324_s23 = sand.u32 (!%p292_p9), 1, %s1452_s10  }
   0xe   : > { %295 = sbr.rel (%p292_p9) target bundleno = 1229 (0x4cd), region = 56  ;;  %p328_p10 = scmp.lt.s32.totalorder (!%p292_p9), %s1220_s21, 3 }
   0xf   : > { %s1219_s24 = sshll.u32 (!%p292_p9), %s324_s23, 7  ;;  %s1263_s25 = sshll.u32 (!%p292_p9), %s1539_s13, 8 }
  0x10   : > { %s1854_s13 = scalar_lea.hbm (!%p292_p9), %s1913_s9, %s1263_s25  ;;  %s1864_s29 = scalar_lea.sflag (!%p292_p9), [#allocation3], %s324_s23 }
  0x11   : > { %s1464_s16 = smov (!%p292_p9), [#allocation2]  }
  0x12   : > { %s1404_s17 = sshll.u32 (!%p292_p9), %s1464_s16, 4  ;;  %s1405_s17 = int_to_ptr.vmem [resolvable:$false] %s1404_s17 }
  0x13   : > { %v1462_v0 = vmov 0.0   ;;  %v1463_v1 = vmov 0   ;;  %s1921_s21 = smov (!%p328_p10, %s1220_s21), 3  ;;  %v350_v2 = vld [vmem:[%s1906_s2 + $0x38] sm:$0xff]  ;;  %v348_v3 = vld [vmem:[%s1906_s2 + $0x28] sm:$0xff]  ;;  %v349_v4 = vld [vmem:[%s1906_s2 + $0x30] sm:$0xff] }
  0x14   : > { %487 = vmatprep.mubr.f32.mxu0 %v1462_v0  ;;  %511 = vmatprep.mubr.f32.mxu1 %v1462_v0  ;;  %s1221_s26 = sshll.u32 %s1921_s21, 2  ;;  %v347_v5 = vld [vmem:[%s1906_s2 + $0x20] sm:$0xff]  ;;  %vm418_vm0 = vcmask 1043456   ;;  %vm393_vm1 = vcmask 31744   ;;  %v346_v10 = vld [vmem:[%s1906_s2 + $0x18] sm:$0xff]  ;;  %v345_v11 = vld [vmem:[%s1906_s2 + $0x10] sm:$0xff] }
  0x15   : > { %1365 = vset.pattern.permute.xlu0 %v1463_v1  ;;  %1366 = vset.pattern.permute.xlu1 %v1463_v1  ;;  %s331_s22 = scalar_lea.vmem %s1904_s0, %s1221_s26  ;;  %v335_v8 = vld [vmem:[%s1905_s1] sm:$0xff]  ;;  %v336_v12 = vld [vmem:[%s1905_s1 + $0x8] sm:$0xff]  ;;  %v337_v16 = vld [vmem:[%s1905_s1 + $0x10] sm:$0xff]  ;;  %vm608_vm2 = vcmask 523264   ;;  %vm881_vm3 = vcmask 130048   ;;  %s1821_s21 = scalar_lea.vmem [#allocation2], %s1219_s24 }
  0x16   : > { %388 = vperm.xlu0 %1365, %v350_v2   ;;  %378 = vperm.xlu1 %1366, %v348_v3   ;;  %v334_v6 = vld [vmem:[%s331_s22] sm:$0xff]  ;;  %v340_v13 = vld [vmem:[%s1905_s1 + $0x28] sm:$0xff]  ;;  %v341_v17 = vld [vmem:[%s1905_s1 + $0x30] sm:$0xff]  ;;  %s1153_s27 = sshll.u32 %s1821_s21, 4  ;;  %s1406_s22 = scalar_lea.vmem %s1405_s17, 4096  ;;  %s1856_s27 = int_to_ptr.vmem [resolvable:$true] %s1153_s27 }
  0x17   : > { %v392_v7 = vcombine.high %v334_v6, %v334_v6  ;;  %v339_v9 = vld [vmem:[%s1905_s1 + $0x20] sm:$0xff]  ;;  %v344_v14 = vld [vmem:[%s1906_s2 + $0x8] sm:$0xff]  ;;  %v567_v18 = vld [vmem:[%s1908_s4 + $0x38] sm:$0xff]  ;;  %s1400_s14 = scalar_lea.vmem %s1856_s27, 2048  ;;  %p1407_p0 = scmp.lt.s32.totalorder %s1856_s27, %s1405_s17 }
  0x18   : > { %v343_v15 = vld [vmem:[%s1906_s2] sm:$0xff]  ;;  %v566_v19 = vld [vmem:[%s1908_s4 + $0x30] sm:$0xff]  ;;  %v338_v20 = vld [vmem:[%s1905_s1 + $0x18] sm:$0xff]  ;;  %p1401_p11 = scmp.ne.s32.totalorder %s1856_s27, %s1400_s14  ;;  %p1408_p1 = scmp.lt.s32.totalorder %s1406_s22, %s1400_s14 }
  0x19   : > { %1222 = vmatprep.subr.msk.mxu0 %vm418_vm0, %v392_v7  ;;  %1319 = vmatprep.subr.msk.mxu1 %vm418_vm0, %v392_v7  ;;  %v342_v21 = vld [vmem:[%s1905_s1 + $0x38] sm:$0xff]  ;;  %v565_v22 = vld [vmem:[%s1908_s4 + $0x28] sm:$0xff]  ;;  %v564_v23 = vld [vmem:[%s1908_s4 + $0x20] sm:$0xff] }
  0x1a   : > { %383 = vperm.xlu0 %1365, %v349_v4   ;;  %373 = vperm.xlu1 %1366, %v347_v5   ;;  %v563_v24 = vld [vmem:[%s1908_s4 + $0x18] sm:$0xff]  ;;  %v562_v25 = vld [vmem:[%s1908_s4 + $0x10] sm:$0xff]  ;;  %v561_v26 = vld [vmem:[%s1908_s4 + $0x8] sm:$0xff]  ;;  %p1402_p12 = pnand %p1401_p11, %p1556_p5  ;;  %p1409_p2 = por %p1408_p1, %p1407_p0 }
  0x1b   : > { %1223 = vmatpush1.msk.msra.mxu0 %vm418_vm0, %v334_v6  ;;  %1320 = vmatpush1.msk.msra.mxu1 %vm418_vm0, %v334_v6  ;;  %v560_v27 = vld [vmem:[%s1908_s4] sm:$0xff] }
  0x1c   : > { %1224 = vmatmul.mubr.msk.f32.vlgmr.msra.gmra.mxu0 %vm393_vm1, %v335_v8  ;;  %1228 = vmatmul.mubr.msk.f32.vlgmr.msra.gmra.mxu1 %vm393_vm1, %v339_v9  ;;  %p1403_p13 = pneg %p1402_p12 }
  0x1d   : > { %493 = vmatprep.mubr.f32.mxu0 %v1462_v0  ;;  %517 = vmatprep.mubr.f32.mxu1 %v1462_v0 }
  0x1e   : > { %368 = vperm.xlu0 %1365, %v346_v10   ;;  %363 = vperm.xlu1 %1366, %v345_v11   ;;  %p1410_p3 = pnand %p1409_p2, %p1403_p13 }
  0x20   : > { %1225 = vmatmul.mubr.msk.f32.gmra.mxu0 %vm393_vm1, %v336_v12  ;;  %1229 = vmatmul.mubr.msk.f32.gmra.mxu1 %vm393_vm1, %v340_v13 }
  0x21   : > { %499 = vmatprep.mubr.f32.mxu0 %v1462_v0  ;;  %523 = vmatprep.mubr.f32.mxu1 %v1462_v0 }
  0x22   : > { %358 = vperm.xlu0 %1365, %v344_v14   ;;  %353 = vperm.xlu1 %1366, %v343_v15  }
  0x24   : > { %1226 = vmatmul.mubr.msk.f32.gmra.mxu0 %vm393_vm1, %v337_v16  ;;  %1230 = vmatmul.mubr.msk.f32.gmra.mxu1 %vm393_vm1, %v341_v17 }
  0x25   : > { %505 = vmatprep.mubr.f32.mxu0 %v1462_v0  ;;  %529 = vmatprep.mubr.f32.mxu1 %v1462_v0 }
  0x26   : > { %605 = vperm.xlu0 %1365, %v567_v18   ;;  %600 = vperm.xlu1 %1366, %v566_v19  }
  0x28   : > { %1227 = vmatmul.mubr.msk.f32.gmra.mxu0 %vm393_vm1, %v338_v20  ;;  %1231 = vmatmul.mubr.msk.f32.gmra.mxu1 %vm393_vm1, %v342_v21  ;;  %v552_v21 = vld [vmem:[%s1907_s3] sm:$0xff] }
  0x29   : > { %697 = vmatprep.mubr.f32.mxu1 %v1462_v0 }
  0x2a   : > { %595 = vperm.xlu0 %1365, %v565_v22   ;;  %590 = vperm.xlu1 %1366, %v564_v23   ;;  %v553_v22 = vld [vmem:[%s1907_s3 + $0x8] sm:$0xff]  ;;  %v554_v23 = vld [vmem:[%s1907_s3 + $0x10] sm:$0xff] }
  0x2e   : > { %585 = vperm.xlu0 %1365, %v563_v24   ;;  %580 = vperm.xlu1 %1366, %v562_v25   ;;  %v555_v24 = vld [vmem:[%s1907_s3 + $0x18] sm:$0xff]  ;;  %v556_v25 = vld [vmem:[%s1907_s3 + $0x20] sm:$0xff] }
  0x32   : > { %575 = vperm.xlu0 %1365, %v561_v26   ;;  %570 = vperm.xlu1 %1366, %v560_v27   ;;  %v557_v26 = vld [vmem:[%s1907_s3 + $0x28] sm:$0xff]  ;;  %v558_v27 = vld [vmem:[%s1907_s3 + $0x30] sm:$0xff] }
  0x91   : > { %v389_v34 = vpop.permute.xlu0 %388  ;;  %v379_v37 = vpop.permute.xlu1 %378 }
  0x95   : > { %v384_v42 = vpop.permute.xlu0 %383  ;;  %v374_v44 = vpop.permute.xlu1 %373 }
  0x99   : > { %v369_v53 = vpop.permute.xlu0 %368  ;;  %v364_v59 = vpop.permute.xlu1 %363 }
  0x9d   : > { %v359_v5 = vpop.permute.xlu0 %358  ;;  %v354_v10 = vpop.permute.xlu1 %353 }
  0xdc   : > { %v489_v28 = vpop.f32.mrf.mxu0  ;;  %v513_v29 = vpop.f32.mrf.mxu1 }
  0xdd   : > { %v514_v60 = vadd.f32 %v513_v29, %v374_v44  ;;  %v490_v15 = vadd.f32 %v489_v28, %v354_v10  ;;  %v559_v28 = vld [vmem:[%s1907_s3 + $0x38] sm:$0xff] }
  0xde   : > { %v491_v30 = vpop.f32.mrf.mxu0  ;;  %v515_v31 = vpop.f32.mrf.mxu1 }
  0xdf   : > { %v516_v57 = vadd.f32 %v515_v31, %v374_v44  ;;  %v544_v6 = vmax.f32 %v514_v60, 0.0  ;;  %v492_v13 = vadd.f32 %v491_v30, %v354_v10  ;;  %v536_v20 = vmax.f32 %v490_v15, 0.0 }
  0xe0   : > { %v495_v32 = vpop.f32.mrf.mxu0  ;;  %v519_v33 = vpop.f32.mrf.mxu1 }
  0xe1   : > { %v520_v54 = vadd.f32 %v519_v33, %v379_v37  ;;  %v545_v3 = vmax.f32 %v516_v57, 0.0  ;;  %v496_v11 = vadd.f32 %v495_v32, %v359_v5  ;;  %v537_v19 = vmax.f32 %v492_v13, 0.0  ;;  %v778_v13 = vld [vmem:[%s1909_s5] sm:$0xff] }
  0xe2   : > { %v497_v35 = vpop.f32.mrf.mxu0  ;;  %v521_v36 = vpop.f32.mrf.mxu1  ;;  %1300 = vmatprep.mubr.msk.f32.mxu0 %vm608_vm2, %v778_v13 }
  0xe3   : > { %v522_v51 = vadd.f32 %v521_v36, %v379_v37  ;;  %v546_v1 = vmax.f32 %v520_v54, 0.0  ;;  %v498_v8 = vadd.f32 %v497_v35, %v359_v5  ;;  %v538_v18 = vmax.f32 %v496_v11, 0.0  ;;  %v606_v36 = vpop.permute.xlu0 %605 }
  0xe4   : > { %v501_v38 = vpop.f32.mrf.mxu0  ;;  %v525_v39 = vpop.f32.mrf.mxu1 }
  0xe5   : > { %v526_v50 = vadd.f32 %v525_v39, %v384_v42  ;;  %v547_v62 = vmax.f32 %v522_v51, 0.0  ;;  %v502_v7 = vadd.f32 %v501_v38, %v364_v59  ;;  %v539_v17 = vmax.f32 %v498_v8, 0.0 }
  0xe6   : > { %v503_v40 = vpop.f32.mrf.mxu0  ;;  %v527_v41 = vpop.f32.mrf.mxu1 }
  0xe7   : > { %v528_v48 = vadd.f32 %v527_v41, %v384_v42  ;;  %v548_v61 = vmax.f32 %v526_v50, 0.0  ;;  %v504_v4 = vadd.f32 %v503_v40, %v364_v59  ;;  %v540_v16 = vmax.f32 %v502_v7, 0.0  ;;  %v596_v40 = vpop.permute.xlu0 %595 }
  0xe8   : > { %v531_v43 = vpop.f32.mrf.mxu1  ;;  %v507_v45 = vpop.f32.mrf.mxu0 }
  0xe9   : > { %v532_v46 = vadd.f32 %v531_v43, %v389_v34  ;;  %v549_v58 = vmax.f32 %v528_v48, 0.0  ;;  %v508_v2 = vadd.f32 %v507_v45, %v369_v53  ;;  %v541_v14 = vmax.f32 %v504_v4, 0.0  ;;  %v601_v43 = vpop.permute.xlu1 %600 }
  0xea   : > { %v533_v47 = vpop.f32.mrf.mxu1  ;;  %v509_v56 = vpop.f32.mrf.mxu0 }
  0xeb   : > { %v534_v49 = vadd.f32 %v533_v47, %v389_v34  ;;  %v550_v55 = vmax.f32 %v532_v46, 0.0  ;;  %v510_v63 = vadd.f32 %v509_v56, %v369_v53  ;;  %v542_v12 = vmax.f32 %v508_v2, 0.0  ;;  %v586_v44 = vpop.permute.xlu0 %585 }
  0xed   : > { %v551_v52 = vmax.f32 %v534_v49, 0.0  ;;  %v543_v9 = vmax.f32 %v510_v63, 0.0 }
  0xef   : > { %649 = vmatprep.subr.mxu1 %v551_v52  ;;  %v576_v56 = vpop.permute.xlu0 %575 }
  0xf0   : > { %650 = vmatpush1.msra.mxu1 %v550_v55  ;;  %v591_v55 = vpop.permute.xlu1 %590 }
  0xf1   : > { %651 = vmatprep.subr.mxu1 %v549_v58 }
  0xf2   : > { %652 = vmatpush1.msra.mxu1 %v548_v61 }
  0xf3   : > { %653 = vmatprep.subr.mxu1 %v547_v62 }
  0xf4   : > { %654 = vmatpush1.msra.mxu1 %v546_v1 }
  0xf5   : > { %655 = vmatprep.subr.mxu1 %v545_v3  ;;  %v581_v3 = vpop.permute.xlu1 %580 }
  0xf6   : > { %656 = vmatpush1.msra.mxu1 %v544_v6 }
  0xf7   : > { %657 = vmatprep.subr.mxu1 %v543_v9 }
  0xf8   : > { %658 = vmatpush1.msra.mxu1 %v542_v12 }
  0xf9   : > { %659 = vmatprep.subr.mxu1 %v541_v14  ;;  %v571_v8 = vpop.permute.xlu1 %570 }
  0xfa   : > { %660 = vmatpush1.msra.mxu1 %v540_v16 }
  0xfb   : > { %661 = vmatprep.subr.mxu1 %v539_v17 }
  0xfc   : > { %662 = vmatpush1.msra.mxu1 %v538_v18 }
  0xfd   : > { %663 = vmatprep.subr.mxu1 %v537_v19 }
  0xfe   : > { %664 = vmatpush1.msra.mxu1 %v536_v20 }
  0xff   : > { %1232 = vmatmul.mubr.msk.f32.vlgmr.msra.gmra.mxu1 %vm608_vm2, %v552_v21 }
 0x100   : > { %703 = vmatprep.mubr.f32.mxu1 %v1462_v0 }
 0x103   : > { %1233 = vmatmul.mubr.msk.f32.gmra.mxu1 %vm608_vm2, %v553_v22 }
 0x104   : > { %709 = vmatprep.mubr.f32.mxu1 %v1462_v0 }
 0x107   : > { %1234 = vmatmul.mubr.msk.f32.gmra.mxu1 %vm608_vm2, %v554_v23 }
 0x108   : > { %715 = vmatprep.mubr.f32.mxu1 %v1462_v0 }
 0x10b   : > { %1235 = vmatmul.mubr.msk.f32.gmra.mxu1 %vm608_vm2, %v555_v24 }
 0x10c   : > { %721 = vmatprep.mubr.f32.mxu1 %v1462_v0 }
 0x10f   : > { %1236 = vmatmul.mubr.msk.f32.gmra.mxu1 %vm608_vm2, %v556_v25 }
 0x110   : > { %727 = vmatprep.mubr.f32.mxu1 %v1462_v0 }
 0x113   : > { %1237 = vmatmul.mubr.msk.f32.gmra.mxu1 %vm608_vm2, %v557_v26 }
 0x114   : > { %733 = vmatprep.mubr.f32.mxu1 %v1462_v0 }
 0x117   : > { %1238 = vmatmul.mubr.msk.f32.gmra.mxu1 %vm608_vm2, %v558_v27 }
 0x118   : > { %739 = vmatprep.mubr.f32.mxu1 %v1462_v0 }
 0x11b   : > { %1239 = vmatmul.mubr.msk.f32.gmra.mxu1 %vm608_vm2, %v559_v28 }
 0x1bf   : > { %v699_v29 = vpop.f32.mrf.mxu1 }
 0x1c0   : > { %v1742_v11 = vadd.f32 %v699_v29, %v571_v8 }
 0x1c1   : > { %v701_v30 = vpop.f32.mrf.mxu1 }
 0x1c2   : > { %v1738_v9 = vadd.f32 %v701_v30, %v571_v8  ;;  %v779_v30 = vld [vmem:[%s1909_s5 + $0x8] sm:$0xff] }
 0x1c3   : > { %v705_v31 = vpop.f32.mrf.mxu1 }
 0x1c4   : > { %v1720_v61 = vadd.f32 %v705_v31, %v576_v56  ;;  %v746_v12 = vadd.f32 %v1738_v9, %v1742_v11  ;;  %v865_v31 = vld [vmem:[%s1911_s7] sm:$0xff] }
 0x1c5   : > { %v707_v32 = vpop.f32.mrf.mxu1 }
 0x1c6   : > { %v1712_v57 = vadd.f32 %v707_v32, %v576_v56  ;;  %v781_v32 = vld [vmem:[%s1910_s6 + $0x8] sm:$0xff] }
 0x1c7   : > { %v711_v33 = vpop.f32.mrf.mxu1 }
 0x1c8   : > { %v749_v2 = vadd.f32 %v1712_v57, %v1720_v61  ;;  %v1736_v7 = vadd.f32 %v711_v33, %v581_v3 }
 0x1c9   : > { %v713_v34 = vpop.f32.mrf.mxu1 }
 0x1ca   : > { %v1732_v5 = vadd.f32 %v713_v34, %v581_v3  ;;  %v780_v34 = vld [vmem:[%s1910_s6] sm:$0xff]  ;;  %v875_v3 = vld [vmem:[%s1912_s8 + $0x10] sm:$0xff] }
 0x1cb   : > { %v717_v35 = vpop.f32.mrf.mxu1 }
 0x1cc   : > { %v1706_v52 = vadd.f32 %v717_v35, %v586_v44  ;;  %v752_v10 = vadd.f32 %v1732_v5, %v1736_v7 }
 0x1cd   : > { %v719_v37 = vpop.f32.mrf.mxu1 }
 0x1ce   : > { %v1702_v49 = vadd.f32 %v719_v37, %v586_v44  ;;  %v871_v44 = vld [vmem:[%s1911_s7 + $0x30] sm:$0xff] }
 0x1cf   : > { %v723_v38 = vpop.f32.mrf.mxu1 }
 0x1d0   : > { %v755_v60 = vadd.f32 %v1702_v49, %v1706_v52  ;;  %v1730_v4 = vadd.f32 %v723_v38, %v591_v55 }
 0x1d1   : > { %v725_v39 = vpop.f32.mrf.mxu1 }
 0x1d2   : > { %v1724_v63 = vadd.f32 %v725_v39, %v591_v55 }
 0x1d3   : > { %v729_v41 = vpop.f32.mrf.mxu1 }
 0x1d4   : > { %v1722_v62 = vadd.f32 %v729_v41, %v596_v40  ;;  %v758_v6 = vadd.f32 %v1724_v63, %v1730_v4  ;;  %v867_v41 = vld [vmem:[%s1911_s7 + $0x10] sm:$0xff] }
 0x1d5   : > { %v731_v0 = vpop.f32.mrf.mxu1 }
 0x1d6   : > { %v1714_v58 = vadd.f32 %v731_v0, %v596_v40  ;;  %v866_v40 = vld [vmem:[%s1911_s7 + $0x8] sm:$0xff]  ;;  %v868_v0 = vld [vmem:[%s1911_s7 + $0x18] sm:$0xff] }
 0x1d7   : > { %v735_v42 = vpop.f32.mrf.mxu1 }
 0x1d8   : > { %v1698_v46 = vadd.f32 %v735_v42, %v601_v43  ;;  %v761_v1 = vadd.f32 %v1714_v58, %v1722_v62  ;;  %v869_v42 = vld [vmem:[%s1911_s7 + $0x20] sm:$0xff] }
 0x1d9   : > { %v737_v45 = vpop.f32.mrf.mxu1 }
 0x1da   : > { %v1700_v47 = vadd.f32 %v737_v45, %v601_v43  ;;  %v870_v43 = vld [vmem:[%s1911_s7 + $0x28] sm:$0xff]  ;;  %v872_v45 = vld [vmem:[%s1911_s7 + $0x38] sm:$0xff] }
 0x1db   : > { %v741_v48 = vpop.f32.mrf.mxu1 }
 0x1dc   : > { %v764_v50 = vadd.f32 %v1700_v47, %v1698_v46  ;;  %v1708_v53 = vadd.f32 %v741_v48, %v606_v36  ;;  %v874_v48 = vld [vmem:[%s1912_s8 + $0x8] sm:$0xff] }
 0x1dd   : > { %v743_v51 = vpop.f32.mrf.mxu1 }
 0x1de   : > { %v1710_v54 = vadd.f32 %v743_v51, %v606_v36  ;;  %765 = vadd.xlane.f32.xlu1 %v764_v50  ;;  %v873_v51 = vld [vmem:[%s1912_s8] sm:$0xff] }
 0x1e0   : > { %v767_v59 = vadd.f32 %v1710_v54, %v1708_v53 }
 0x1e2   : > { %768 = vadd.xlane.f32.xlu0 %v767_v59  ;;  %756 = vadd.xlane.f32.xlu1 %v755_v60  ;;  %v876_v59 = vld [vmem:[%s1912_s8 + $0x18] sm:$0xff] }
 0x1e6   : > { %762 = vadd.xlane.f32.xlu0 %v761_v1  ;;  %750 = vadd.xlane.f32.xlu1 %v749_v2 }
 0x1ea   : > { %759 = vadd.xlane.f32.xlu0 %v758_v6 }
 0x1ee   : > { %753 = vadd.xlane.f32.xlu0 %v752_v10 }
 0x1f2   : > { %747 = vadd.xlane.f32.xlu0 %v746_v12  ;;  %v878_v12 = vld [vmem:[%s1912_s8 + $0x28] sm:$0xff] }
 0x267   : > { %v766_v14 = vpop.xlane.xlu1 %765 }
 0x268   : > { %v776_v17 = vmul.f32 0.00390625, %v766_v14 }
 0x26b   : > { %v769_v15 = vpop.xlane.xlu0 %768  ;;  %v757_v20 = vpop.xlane.xlu1 %756 }
 0x26c   : > { %v777_v16 = vmul.f32 0.00390625, %v769_v15  ;;  %v773_v23 = vmul.f32 0.00390625, %v757_v20  ;;  %v880_v20 = vld [vmem:[%s1912_s8 + $0x38] sm:$0xff] }
 0x26e   : > { %1284 = vmatprep.subr.mxu0 %v777_v16 }
 0x26f   : > { %1285 = vmatpush3.msra.mxu0 %v777_v16  ;;  %v763_v18 = vpop.xlane.xlu0 %762  ;;  %v751_v24 = vpop.xlane.xlu1 %750  ;;  %v877_v16 = vld [vmem:[%s1912_s8 + $0x20] sm:$0xff] }
 0x270   : > { %v775_v19 = vmul.f32 0.00390625, %v763_v18  ;;  %1286 = vmatprep.subr.mxu0 %v776_v17  ;;  %v771_v27 = vmul.f32 0.00390625, %v751_v24  ;;  %v879_v24 = vld [vmem:[%s1912_s8 + $0x30] sm:$0xff] }
 0x271   : > { %1287 = vmatpush3.msra.mxu0 %v776_v17 }
 0x272   : > { %1288 = vmatprep.subr.mxu0 %v775_v19 }
 0x273   : > { %1289 = vmatpush3.msra.mxu0 %v775_v19  ;;  %v760_v21 = vpop.xlane.xlu0 %759 }
 0x274   : > { %v774_v22 = vmul.f32 0.00390625, %v760_v21 }
 0x276   : > { %1290 = vmatprep.subr.mxu0 %v774_v22 }
 0x277   : > { %1291 = vmatpush3.msra.mxu0 %v774_v22  ;;  %v754_v25 = vpop.xlane.xlu0 %753 }
 0x278   : > { %v772_v26 = vmul.f32 0.00390625, %v754_v25  ;;  %1292 = vmatprep.subr.mxu0 %v773_v23 }
 0x279   : > { %1293 = vmatpush3.msra.mxu0 %v773_v23 }
 0x27a   : > { %1294 = vmatprep.subr.mxu0 %v772_v26 }
 0x27b   : > { %1295 = vmatpush3.msra.mxu0 %v772_v26  ;;  %v748_v28 = vpop.xlane.xlu0 %747 }
 0x27c   : > { %v770_v29 = vmul.f32 0.00390625, %v748_v28  ;;  %1296 = vmatprep.subr.mxu0 %v771_v27 }
 0x27d   : > { %1297 = vmatpush3.msra.mxu0 %v771_v27 }
 0x27e   : > { %1298 = vmatprep.subr.mxu0 %v770_v29 }
 0x27f   : > { %1299 = vmatpush3.msra.mxu0 %v770_v29 }
 0x280   : > { %1301 = vmatmul.mubr.msk.f32.vlgmr.msra.gmra.mxu0 %vm608_vm2, %v779_v30 }
 0x281   : > { %1307 = vmatprep.mubr.msk.f32.mxu0 %vm881_vm3, %v865_v31 }
 0x340   : > { %v1302_v33 = vpop.f32.mrf.mxu0 }
 0x341   : > { %v860_v35 = vadd.f32 %v1302_v33, %v781_v32 }
 0x342   : > { %v854_v36 = vpop.f32.mrf.mxu0 }
 0x343   : > { %v864_v37 = vmax.f32 %v860_v35, 0.0  ;;  %v855_v38 = vadd.f32 %v854_v36, %v780_v34 }
 0x345   : > { %v863_v39 = vmax.f32 %v855_v38, 0.0  ;;  %1303 = vmatprep.subr.mxu0 %v864_v37 }
 0x346   : > { %1304 = vmatpush3.msra.mxu0 %v864_v37 }
 0x347   : > { %1305 = vmatprep.subr.mxu0 %v863_v39 }
 0x348   : > { %1306 = vmatpush3.msra.mxu0 %v863_v39 }
 0x349   : > { %1308 = vmatmul.mubr.msk.f32.vlgmr.msra.gmra.mxu0 %vm881_vm3, %v866_v40 }
 0x34a   : > { %1310 = vmatprep.mubr.msk.f32.mxu0 %vm881_vm3, %v867_v41 }
 0x34d   : > { %1311 = vmatmul.mubr.msk.f32.gmra.mxu0 %vm881_vm3, %v868_v0 }
 0x34e   : > { %1313 = vmatprep.mubr.msk.f32.mxu0 %vm881_vm3, %v869_v42 }
 0x351   : > { %1314 = vmatmul.mubr.msk.f32.gmra.mxu0 %vm881_vm3, %v870_v43 }
 0x352   : > { %1316 = vmatprep.mubr.msk.f32.mxu0 %vm881_vm3, %v871_v44 }
 0x355   : > { %1317 = vmatmul.mubr.msk.f32.gmra.mxu0 %vm881_vm3, %v872_v45 }
 0x409   : > { %v1309_v50 = vpop.f32.mrf.mxu0 }
 0x40a   : > { %v978_v55 = vadd.f32 %v1309_v50, %v874_v48 }
 0x40b   : > { %v972_v56 = vpop.f32.mrf.mxu0 }
 0x40c   : > { %v1251_v60 = vmul.f32 -1.442695, %v978_v55  ;;  %v973_v1 = vadd.f32 %v972_v56, %v873_v51 }
 0x40d   : > { %v1312_v2 = vpop.f32.mrf.mxu0 }
 0x40e   : > { %1368 = vpow2.f32 %v1251_v60  ;;  %v1250_v6 = vmul.f32 -1.442695, %v973_v1  ;;  %v988_v8 = vadd.f32 %v1312_v2, %v876_v59 }
 0x40f   : > { %v982_v10 = vpop.f32.mrf.mxu0 }
 0x410   : > { %1370 = vpow2.f32 %v1250_v6  ;;  %v1253_v13 = vmul.f32 -1.442695, %v988_v8  ;;  %v983_v14 = vadd.f32 %v982_v10, %v875_v3 }
 0x411   : > { %v1315_v15 = vpop.f32.mrf.mxu0 }
 0x412   : > { %1372 = vpow2.f32 %v1253_v13  ;;  %v1252_v17 = vmul.f32 -1.442695, %v983_v14  ;;  %v998_v18 = vadd.f32 %v1315_v15, %v878_v12 }
 0x413   : > { %v992_v19 = vpop.f32.mrf.mxu0 }
 0x414   : > { %1374 = vpow2.f32 %v1252_v17  ;;  %v1255_v21 = vmul.f32 -1.442695, %v998_v18  ;;  %v993_v22 = vadd.f32 %v992_v19, %v877_v16 }
 0x415   : > { %v1318_v23 = vpop.f32.mrf.mxu0 }
 0x416   : > { %1376 = vpow2.f32 %v1255_v21  ;;  %v1254_v25 = vmul.f32 -1.442695, %v993_v22  ;;  %v1008_v26 = vadd.f32 %v1318_v23, %v880_v20 }
 0x417   : > { %v1002_v27 = vpop.f32.mrf.mxu0 }
 0x418   : > { %1378 = vpow2.f32 %v1254_v25  ;;  %v1257_v28 = vmul.f32 -1.442695, %v1008_v26  ;;  %v1003_v29 = vadd.f32 %v1002_v27, %v879_v24 }
 0x41a   : > { %1380 = vpow2.f32 %v1257_v28  ;;  %v1256_v30 = vmul.f32 -1.442695, %v1003_v29 }
 0x41b   : > { %v1369_v31 = vpop.eup %1368 }
 0x41c   : > { %v1036_v32 = vadd.f32 1.0, %v1369_v31  ;;  %1382 = vpow2.f32 %v1256_v30 }
 0x41d   : > { %v1371_v33 = vpop.eup %1370 }
 0x41e   : > { %1384 = vrcp.f32 %v1036_v32  ;;  %v1035_v34 = vadd.f32 1.0, %v1371_v33 }
 0x41f   : > { %v1373_v35 = vpop.eup %1372 }
 0x420   : > { %1386 = vrcp.f32 %v1035_v34  ;;  %v1038_v36 = vadd.f32 1.0, %v1373_v35 }
 0x421   : > { %v1375_v37 = vpop.eup %1374 }
 0x422   : > { %1388 = vrcp.f32 %v1038_v36  ;;  %v1037_v38 = vadd.f32 1.0, %v1375_v37 }
 0x423   : > { %v1377_v39 = vpop.eup %1376 }
 0x424   : > { %1390 = vrcp.f32 %v1037_v38  ;;  %v1040_v41 = vadd.f32 1.0, %v1377_v39 }
 0x425   : > { %v1379_v40 = vpop.eup %1378 }
 0x426   : > { %v1039_v0 = vadd.f32 1.0, %v1379_v40 }
 0x427   : > { %v1381_v42 = vpop.eup %1380 }
 0x428   : > { %1392 = vrcp.f32 %v1039_v0  ;;  %v1042_v44 = vadd.f32 1.0, %v1381_v42 }
 0x429   : > { %v1383_v43 = vpop.eup %1382  ;;  %1394 = vrcp.f32 %v1040_v41 }
 0x42a   : > { %v1041_v45 = vadd.f32 1.0, %v1383_v43 }
 0x42b   : > { %v1385_v48 = vpop.eup %1384 }
 0x42c   : > { %1396 = vrcp.f32 %v1041_v45  ;;  %v1060_v50 = vadd.f32 1.0, %v1385_v48 }
 0x42d   : > { %v1387_v51 = vpop.eup %1386  ;;  %1398 = vrcp.f32 %v1042_v44 }
 0x42e   : > { %1074 = vperm.xlu0 %1365, %v1060_v50   ;;  %v1059_v55 = vadd.f32 1.0, %v1387_v51 }
 0x42f   : > { %v1389_v56 = vpop.eup %1388 }
 0x430   : > { %1069 = vperm.xlu1 %1366, %v1059_v55   ;;  %v1062_v59 = vadd.f32 1.0, %v1389_v56 }
 0x431   : > { %v1391_v60 = vpop.eup %1390 }
 0x432   : > { %v1061_v3 = vadd.f32 1.0, %v1391_v60 }
 0x434   : > { %1084 = vperm.xlu1 %1366, %v1062_v59  }
 0x435   : > { %v1393_v1 = vpop.eup %1392 }
 0x436   : > { %v1063_v2 = vadd.f32 1.0, %v1393_v1  ;;  %v1395_v6 = vpop.eup %1394 }
 0x437   : > { %v1064_v12 = vadd.f32 1.0, %v1395_v6 }
 0x438   : > { %1089 = vperm.xlu0 %1365, %v1063_v2   ;;  %1079 = vperm.xlu1 %1366, %v1061_v3  }
 0x439   : > { %v1397_v8 = vpop.eup %1396 }
 0x43a   : > { %v1065_v10 = vadd.f32 1.0, %v1397_v8  ;;  %v1399_v13 = vpop.eup %1398 }
 0x43b   : > { %v1066_v14 = vadd.f32 1.0, %v1399_v13 }
 0x43c   : > { %1099 = vperm.xlu0 %1365, %v1065_v10   ;;  %1094 = vperm.xlu1 %1366, %v1064_v12  }
 0x440   : > { %1104 = vperm.xlu1 %1366, %v1066_v14  }
 0x4a9   : > { %v1075_v15 = vpop.permute.xlu0 %1074 }
 0x4aa   : > { %v1109_v16 = vmul.f32 %v1075_v15, %v1720_v61  ;;  %v1110_v17 = vmul.f32 %v1075_v15, %v1712_v57 }
 0x4ab   : > { %v1070_v18 = vpop.permute.xlu1 %1069 }
 0x4ac   : > { %1125 = vst [vmem:[%s1821_s21 + $0x10] sm:$0xff] %v1109_v16  ;;  %1126 = vst [vmem:[%s1821_s21 + $0x18] sm:$0xff] %v1110_v17  ;;  %v1107_v19 = vmul.f32 %v1070_v18, %v1742_v11  ;;  %v1108_v20 = vmul.f32 %v1070_v18, %v1738_v9 }
 0x4ae   : > { %1123 = vst [vmem:[%s1821_s21] sm:$0xff] %v1107_v19  ;;  %1124 = vst [vmem:[%s1821_s21 + $0x8] sm:$0xff] %v1108_v20 }
 0x4af   : > { %v1085_v57 = vpop.permute.xlu1 %1084 }
 0x4b0   : > { %v1113_v61 = vmul.f32 %v1085_v57, %v1706_v52  ;;  %v1114_v21 = vmul.f32 %v1085_v57, %v1702_v49 }
 0x4b2   : > { %1129 = vst [vmem:[%s1821_s21 + $0x30] sm:$0xff] %v1113_v61  ;;  %1130 = vst [vmem:[%s1821_s21 + $0x38] sm:$0xff] %v1114_v21 }
 0x4b3   : > { %v1090_v22 = vpop.permute.xlu0 %1089  ;;  %v1080_v23 = vpop.permute.xlu1 %1079 }
 0x4b4   : > { %v1115_v11 = vmul.f32 %v1090_v22, %v1730_v4  ;;  %v1116_v9 = vmul.f32 %v1090_v22, %v1724_v63  ;;  %v1111_v24 = vmul.f32 %v1080_v23, %v1736_v7  ;;  %v1112_v25 = vmul.f32 %v1080_v23, %v1732_v5 }
 0x4b6   : > { %1131 = vst [vmem:[%s1821_s21 + $0x40] sm:$0xff] %v1115_v11  ;;  %1132 = vst [vmem:[%s1821_s21 + $0x48] sm:$0xff] %v1116_v9 }
 0x4b7   : > { %1127 = vst [vmem:[%s1821_s21 + $0x20] sm:$0xff] %v1111_v24  ;;  %1128 = vst [vmem:[%s1821_s21 + $0x28] sm:$0xff] %v1112_v25  ;;  %v1100_v49 = vpop.permute.xlu0 %1099  ;;  %v1095_v52 = vpop.permute.xlu1 %1094 }
 0x4b8   : > { %v1119_v4 = vmul.f32 %v1100_v49, %v1698_v46  ;;  %v1120_v63 = vmul.f32 %v1100_v49, %v1700_v47  ;;  %v1117_v7 = vmul.f32 %v1095_v52, %v1722_v62  ;;  %v1118_v26 = vmul.f32 %v1095_v52, %v1714_v58 }
 0x4ba   : > { %1135 = vst [vmem:[%s1821_s21 + $0x60] sm:$0xff] %v1119_v4  ;;  %1136 = vst [vmem:[%s1821_s21 + $0x68] sm:$0xff] %v1120_v63 }
 0x4bb   : > { %1133 = vst [vmem:[%s1821_s21 + $0x50] sm:$0xff] %v1117_v7  ;;  %1134 = vst [vmem:[%s1821_s21 + $0x58] sm:$0xff] %v1118_v26  ;;  %v1105_v5 = vpop.permute.xlu1 %1104 }
 0x4bc   : > { %v1121_v46 = vmul.f32 %v1105_v5, %v1708_v53  ;;  %v1122_v47 = vmul.f32 %v1105_v5, %v1710_v54 }
 0x4be   : > { %1137 = vst [vmem:[%s1821_s21 + $0x70] sm:$0xff] %v1121_v46  ;;  %1138 = vst [vmem:[%s1821_s21 + $0x78] sm:$0xff] %v1122_v47 }
 0x4bf   : > { %1413 = shalt.err (!%p1410_p3)
}
 0x4c0   : > { %s1414_s23 = scalar_lea.hbm %s1854_s13, 2048  ;;  %s1418_s25 = scalar_lea.hbm %s1913_s9, 4096 }
 0x4c1   : > { %p1415_p4 = scmp.ne.s32.totalorder %s1854_s13, %s1414_s23  ;;  %p1419_p9 = scmp.lt.s32.totalorder %s1854_s13, %s1913_s9 }
 0x4c2   : > { %p1420_p10 = scmp.lt.s32.totalorder %s1418_s25, %s1414_s23 }
 0x4c3   : > { %p1416_p7 = pnand %p1415_p4, %p1556_p5 }
 0x4c4   : > { %p1421_p11 = por %p1420_p10, %p1419_p9 }
 0x4c5   : > { %p1417_p8 = pneg %p1416_p7 }
 0x4c7   : > { %p1422_p12 = pnand %p1421_p11, %p1417_p8 }
 0x4c9   : > { %1425 = shalt.err (!%p1422_p12)
}
 0x4ca   : > { %s1465_s14 = smov 256   ;;  %s1466_s16 = smov 512  }
 0x4cb   : > { %s1467_s17 = smov 16  }
 0x4cc   : > { %1321 = dma.vmem_to_hbm [thread:$0]  (%p1556_p5), %s1856_s27, 2048, %s1854_s13, %s1864_s29, %s1465_s14, %s1466_s16, %s1467_s17  }
 0x4cd PF: > { %p1327_p13 = scmp.ge.s32.totalorder %s1460_s12, 2  ;;  %s1168_s22 = sand.u32 1, %s1448_s30  }
 0x4ce   : > { %s1169_s23 = scalar_lea.sflag [#allocation3], %s1168_s22 }
 0x4cf   : > { %p1324_p0 = pnand %p1327_p13, %p1560_p6 }
 0x4d1   : > { %p1325_p1 = pneg %p1324_p0 }
 0x4d3   : > { %1443 = dma.done.wait (%p1325_p1), %s1169_s23, 2048  }
 0x4d4   : > { %1445 = vsyncadd (%p1325_p1), %s1169_s23, 4294965248  ;;  %p19_p2 = scmp.ge.s32.totalorder %s1543_s15, 4   ;;  %s1916_s30 = smov %s1452_s10 }
 0x4d5   : > { %s1917_s10 = smov %s1456_s11  ;;  %s1918_s11 = smov %s1554_s18 }
 0x4d6   : > { %s1919_s12 = smov %s1543_s15  ;;  %21 = sbr.rel (!%p19_p2) target bundleno = 3 (0x3), region = 91 }
 0x4db   :  { %1174 = vsyncpa [#allocation3], 1 }
 0x4dc   :  { %1176 = vsyncpa [#allocation3 + $0x1], 1 }

</bundles_post_ra>
